<compile_context>
chip_gen: v5e
topology: v5e:2x2
jax: 0.10.0
libtpu: 0.0.40
codegen_flags: <defaults>
</compile_context>

<pallas_src>
import functools

import jax
import jax.numpy as jnp
from jax.experimental import pallas as pl
from jax.experimental.pallas import tpu as pltpu

_BN_EPS = 1e-5
_LANE = 128
_SUBLANE = 8
_ROW_TILE_TARGET = 1024  # 1024-row tiles; ~3 MiB double-buffered worst case.


def _round_up(x, m):
    return (x + m - 1) // m * m


def _row_tile(n):
    """Row-tile size: 1024 for large arrays, otherwise whole (8-aligned) array."""
    if n >= _ROW_TILE_TARGET:
        return _ROW_TILE_TARGET
    return _round_up(max(n, 1), _SUBLANE)


def _params_parallel():
    return pltpu.CompilerParams(dimension_semantics=("parallel",))


# ---------------------------------------------------------------------------
# Pallas kernels
# ---------------------------------------------------------------------------
def _mm_stats_kernel(x_ref, w_ref, y_ref, ssum_ref, ssq_ref):
    """Pre-BN matmul (bf16 operands, f32 acc) + per-tile BN partial stats.

    Stats are reduced from the f32 accumulator, then y is stored in bf16
    (halves the HBM round trip of the pre-BN intermediate).
    """
    y = jnp.dot(x_ref[...], w_ref[...], preferred_element_type=jnp.float32)
    ssum_ref[...] = jnp.sum(y, axis=0, keepdims=True)
    ssq_ref[...] = jnp.sum(y * y, axis=0, keepdims=True)
    y_ref[...] = y.astype(y_ref.dtype)


def _mm_stats_scaled_kernel(x_ref, rinv_ref, w_ref, y_ref, ssum_ref, ssq_ref):
    """Same as _mm_stats_kernel, with the facet->vertex mean (1/nf_count) and the
    bf16 cast of the scattered vertex tensor fused in (per-row scale input)."""
    xb = (x_ref[...] * rinv_ref[...]).astype(jnp.bfloat16)
    y = jnp.dot(xb, w_ref[...], preferred_element_type=jnp.float32)
    ssum_ref[...] = jnp.sum(y, axis=0, keepdims=True)
    ssq_ref[...] = jnp.sum(y * y, axis=0, keepdims=True)
    y_ref[...] = y.astype(y_ref.dtype)


def _bn_relu_kernel(y_ref, scale_ref, shift_ref, o_ref):
    """Apply folded BN (scale/shift) + ReLU to a bf16 row tile (f32 math)."""
    yf = y_ref[...].astype(jnp.float32)
    o_ref[...] = jnp.maximum(yf * scale_ref[...] + shift_ref[...], 0.0).astype(o_ref.dtype)


def _bn_relu_dw_kernel(y_ref, scale_ref, shift_ref, coeff_ref, wd_ref, z_ref):
    """BN+ReLU of the V2F output fused with the F2V fuzzy depthwise filter.

    cw = sum_k coeff[:, k] * wd[k, :] is a short unrolled VPU FMA (kernel_size
    terms) instead of a 128-padded MXU matmul — coeff/wd stay at true width.
    """
    yf = y_ref[...].astype(jnp.float32)
    facet = jnp.maximum(yf * scale_ref[...] + shift_ref[...], 0.0)
    coeff = coeff_ref[...]
    wd = wd_ref[...]
    cw = coeff[:, 0:1] * wd[0:1, :]
    for k in range(1, wd.shape[0]):            # static unroll over kernel_size
        cw = cw + coeff[:, k:k + 1] * wd[k:k + 1, :]
    z_ref[...] = facet * cw                    # f32 out: feeds f32 segment_sum


# ---------------------------------------------------------------------------
# pallas_call wrappers (row-tiled 1-D "parallel" grids)
# ---------------------------------------------------------------------------
def _mm_stats(x, w, row_tile):
    rows, k = x.shape
    n = w.shape[1]
    nt = rows // row_tile
    return pl.pallas_call(
        _mm_stats_kernel,
        out_shape=(jax.ShapeDtypeStruct((rows, n), jnp.bfloat16),
                   jax.ShapeDtypeStruct((nt, n), jnp.float32),
                   jax.ShapeDtypeStruct((nt, n), jnp.float32)),
        grid_spec=pltpu.PrefetchScalarGridSpec(
            num_scalar_prefetch=0,
            grid=(nt,),
            in_specs=[pl.BlockSpec((row_tile, k), lambda i: (i, 0)),
                      pl.BlockSpec((k, n), lambda i: (0, 0))],
            out_specs=(pl.BlockSpec((row_tile, n), lambda i: (i, 0)),
                       pl.BlockSpec((1, n), lambda i: (i, 0)),
                       pl.BlockSpec((1, n), lambda i: (i, 0)))),
        compiler_params=_params_parallel(),
    )(x, w)


def _mm_stats_scaled(x, rinv, w, row_tile):
    rows, k = x.shape
    n = w.shape[1]
    nt = rows // row_tile
    return pl.pallas_call(
        _mm_stats_scaled_kernel,
        out_shape=(jax.ShapeDtypeStruct((rows, n), jnp.bfloat16),
                   jax.ShapeDtypeStruct((nt, n), jnp.float32),
                   jax.ShapeDtypeStruct((nt, n), jnp.float32)),
        grid_spec=pltpu.PrefetchScalarGridSpec(
            num_scalar_prefetch=0,
            grid=(nt,),
            in_specs=[pl.BlockSpec((row_tile, k), lambda i: (i, 0)),
                      pl.BlockSpec((row_tile, 1), lambda i: (i, 0)),
                      pl.BlockSpec((k, n), lambda i: (0, 0))],
            out_specs=(pl.BlockSpec((row_tile, n), lambda i: (i, 0)),
                       pl.BlockSpec((1, n), lambda i: (i, 0)),
                       pl.BlockSpec((1, n), lambda i: (i, 0)))),
        compiler_params=_params_parallel(),
    )(x, rinv, w)


def _bn_relu(y, scale, shift, row_tile, out_dtype):
    rows, n = y.shape
    nt = rows // row_tile
    return pl.pallas_call(
        _bn_relu_kernel,
        out_shape=jax.ShapeDtypeStruct((rows, n), out_dtype),
        grid_spec=pltpu.PrefetchScalarGridSpec(
            num_scalar_prefetch=0,
            grid=(nt,),
            in_specs=[pl.BlockSpec((row_tile, n), lambda i: (i, 0)),
                      pl.BlockSpec((1, n), lambda i: (0, 0)),
                      pl.BlockSpec((1, n), lambda i: (0, 0))],
            out_specs=pl.BlockSpec((row_tile, n), lambda i: (i, 0))),
        compiler_params=_params_parallel(),
    )(y, scale, shift)


def _bn_relu_dw(y, scale, shift, coeff, wd, row_tile):
    rows, n = y.shape
    kk = coeff.shape[1]
    nt = rows // row_tile
    return pl.pallas_call(
        _bn_relu_dw_kernel,
        out_shape=jax.ShapeDtypeStruct((rows, n), jnp.float32),
        grid_spec=pltpu.PrefetchScalarGridSpec(
            num_scalar_prefetch=0,
            grid=(nt,),
            in_specs=[pl.BlockSpec((row_tile, n), lambda i: (i, 0)),
                      pl.BlockSpec((1, n), lambda i: (0, 0)),
                      pl.BlockSpec((1, n), lambda i: (0, 0)),
                      pl.BlockSpec((row_tile, kk), lambda i: (i, 0)),
                      pl.BlockSpec((kk, n), lambda i: (0, 0))],
            out_specs=pl.BlockSpec((row_tile, n), lambda i: (i, 0))),
        compiler_params=_params_parallel(),
    )(y, scale, shift, coeff, wd)


# ---------------------------------------------------------------------------
# BN fold glue (tiny per-channel reduction over the per-tile partial stats)
# ---------------------------------------------------------------------------
def _bn_fold(ssum, ssq, n_valid, gamma, beta):
    mean = jnp.sum(ssum, axis=0) / n_valid
    ex2 = jnp.sum(ssq, axis=0) / n_valid
    var = jnp.maximum(ex2 - mean * mean, 0.0)      # biased (training-mode) var
    scale = gamma * jax.lax.rsqrt(var + _BN_EPS)
    shift = beta - mean * scale
    return scale[None, :], shift[None, :]


# ---------------------------------------------------------------------------
# Parameter initialization (mirrors the torch module shapes, then folds + pads)
# ---------------------------------------------------------------------------
def _init_v2v(key, c_in, c_mid, c_out, kernel_size):
    k = jax.random.split(key, 4)
    wd1 = 0.1 * jax.random.normal(k[0], (3, 1, c_in), jnp.float32)           # V2F depthwise
    wp1 = 0.1 * jax.random.normal(k[1], (c_in, c_mid), jnp.float32)          # V2F pointwise
    wd2 = 0.1 * jax.random.normal(k[2], (kernel_size, c_mid), jnp.float32)   # F2V fuzzy dw
    wp2 = 0.1 * jax.random.normal(k[3], (c_mid, c_out), jnp.float32)         # F2V pointwise

    k1 = 3 * c_in
    k1p = _round_up(k1, _LANE)
    mp = _round_up(c_mid, _LANE)
    op = _round_up(c_out, _LANE)

    # Fold the depthwise corner weights into the pointwise matmul:
    # W1[c*Cin + j, o] = wd1[c, 0, j] * wp1[j, o]
    w1 = (wd1[:, 0, :, None] * wp1[None, :, :]).reshape(k1, c_mid)
    w1 = jnp.pad(w1, ((0, k1p - k1), (0, mp - c_mid))).astype(jnp.bfloat16)
    wd2_p = jnp.pad(wd2, ((0, 0), (0, mp - c_mid)))        # f32, true kernel_size rows
    w2 = jnp.pad(wp2, ((0, mp - c_mid), (0, op - c_out))).astype(jnp.bfloat16)

    return dict(
        w1=w1, k1p=k1p,
        gamma1=jnp.ones((mp,), jnp.float32), beta1=jnp.zeros((mp,), jnp.float32),
        wd2=wd2_p, w2=w2,
        gamma2=jnp.ones((op,), jnp.float32), beta2=jnp.zeros((op,), jnp.float32),
        c_out=c_out,
    )


def init_encoder_mesh_block(key, in_channels, out_channels, growth_rate,
                            mesh_kernel_size, max_iter=2):
    factor = 4
    keys = jax.random.split(key, 2 * max_iter + 1)
    group = []
    c_in = in_channels
    for n in range(max_iter):
        group.append(_init_v2v(keys[2 * n], c_in,
                               factor * growth_rate, factor * growth_rate,
                               mesh_kernel_size))
        group.append(_init_v2v(keys[2 * n + 1], factor * growth_rate,
                               factor * growth_rate, growth_rate,
                               mesh_kernel_size))
        c_in += growth_rate

    kp = _round_up(c_in, _LANE)
    op = _round_up(out_channels, _LANE)
    w = 0.1 * jax.random.normal(keys[-1], (c_in, out_channels), jnp.float32)
    transit = dict(
        w=jnp.pad(w, ((0, kp - c_in), (0, op - out_channels))).astype(jnp.bfloat16),
        kp=kp, c_out=out_channels,
        gamma=jnp.ones((op,), jnp.float32), beta=jnp.zeros((op,), jnp.float32),
    )
    return dict(group=group, transit=transit, max_iter=max_iter)


# ---------------------------------------------------------------------------
# Forward pass
# ---------------------------------------------------------------------------
def _v2v_conv(x, face, nf_inv_pad, coeff_p, p, nf_pad, nv_pad, rtf, rtv, out_dtype):
    n_vert, c = x.shape
    n_face = face.shape[0]

    # ---- V2F: corner gather -> [Nf, 3*C] bf16 (channel-last, no transpose) ----
    # TODO(synk): move this gather inside the matmul kernel (scalar-prefetched face
    # indices + manual DMA / VMEM-resident vertex slab) to avoid the [Nf, 3C] HBM
    # round trip; kept as XLA glue for lowering robustness (bf16 halves its bytes).
    xg = jnp.take(x, face, axis=0).reshape(n_face, 3 * c)
    xg = jnp.pad(xg, ((0, nf_pad - n_face), (0, p["k1p"] - 3 * c)))

    y1, s1, q1 = _mm_stats(xg, p["w1"], rtf)                   # pre-BN facet feats (bf16)
    scale1, shift1 = _bn_fold(s1, q1, n_face, p["gamma1"], p["beta1"])
    # BN+ReLU fused with the F2V fuzzy depthwise: z[f] = facet[f] * (sum_k coeff[f,k]*wd2[k])
    z = _bn_relu_dw(y1, scale1, shift1, coeff_p, p["wd2"], rtf)[:n_face]

    # ---- F2V: sparse facet->vertex scatter-sum (f32); mean fused into next kernel ----
    # TODO(synk): replace the 3 serialized XLA scatter-adds with a Pallas CSR
    # segment-sum kernel (scalar-prefetched row offsets over sorted face corners).
    v = (jax.ops.segment_sum(z, face[:, 0], num_segments=n_vert)
         + jax.ops.segment_sum(z, face[:, 1], num_segments=n_vert)
         + jax.ops.segment_sum(z, face[:, 2], num_segments=n_vert))
    v = jnp.pad(v, ((0, nv_pad - n_vert), (0, 0)))

    # ---- F2V pointwise (1/nf_count scaling + bf16 cast fused in-kernel) + BN + ReLU ----
    y2, s2, q2 = _mm_stats_scaled(v, nf_inv_pad, p["w2"], rtv)
    scale2, shift2 = _bn_fold(s2, q2, n_vert, p["gamma2"], p["beta2"])
    out = _bn_relu(y2, scale2, shift2, rtv, out_dtype)
    return out[:n_vert, :p["c_out"]]


def encoder_mesh_block(params, inputs, face, full_nf_count, full_vt_map, filt_coeff):
    # TODO(synk): full_vt_map is treated as the identity map (single-resolution
    # encoder stage, no vertex decimation inside this block).
    del full_vt_map
    n_vert = inputs.shape[0]
    n_face = face.shape[0]

    rtf = _row_tile(n_face)
    rtv = _row_tile(n_vert)
    nf_pad = _round_up(n_face, rtf)
    nv_pad = _round_up(n_vert, rtv)

    nf_inv = 1.0 / jnp.maximum(full_nf_count.astype(jnp.float32), 1.0)
    nf_inv_pad = jnp.pad(nf_inv[:, None], ((0, nv_pad - n_vert), (0, 0)))

    # filt_coeff kept at its true width (in-kernel VPU FMA; no 128-lane padding).
    coeff_p = jnp.pad(filt_coeff.astype(jnp.float32), ((0, nf_pad - n_face), (0, 0)))

    group = params["group"]
    feats = inputs.astype(jnp.bfloat16)              # feature map stays bf16 end-to-end
    for n in range(params["max_iter"]):
        net = _v2v_conv(feats, face, nf_inv_pad, coeff_p, group[2 * n],
                        nf_pad, nv_pad, rtf, rtv, jnp.bfloat16)
        net = _v2v_conv(net, face, nf_inv_pad, coeff_p, group[2 * n + 1],
                        nf_pad, nv_pad, rtf, rtv, jnp.bfloat16)
        # TODO(synk): a preallocated channel slab written in place would avoid
        # re-copying the growing feature map, but the sub-128 (growth_rate-wide)
        # column offsets cannot be expressed as lane-aligned out-BlockSpec offsets,
        # so the concat stays in XLA (bf16 now, half the bytes of v2).
        feats = jnp.concatenate([feats, net], axis=-1)

    t = params["transit"]
    c = feats.shape[1]
    xp = jnp.pad(feats, ((0, nv_pad - n_vert), (0, t["kp"] - c)))   # already bf16
    y, s, q = _mm_stats(xp, t["w"], rtv)
    scale, shift = _bn_fold(s, q, n_vert, t["gamma"], t["beta"])
    out = _bn_relu(y, scale, shift, rtv, jnp.float32)
    return out[:n_vert, :t["c_out"]]


# ---------------------------------------------------------------------------
# Demo
# ---------------------------------------------------------------------------
if __name__ == "__main__":
    key = jax.random.PRNGKey(0)
    k_x, k_face, k_coeff, k_params = jax.random.split(key, 4)

    # small synthetic mesh / config
    num_vertices, num_faces = 16, 24
    in_channels, out_channels, growth_rate = 4, 16, 4
    mesh_kernel_size, max_iter = 3, 2

    x = jax.random.normal(k_x, (num_vertices, in_channels), jnp.float32)
    face = jax.random.randint(k_face, (num_faces, 3), 0, num_vertices,
                              dtype=jnp.int32)
    # number of incident faces per vertex (with multiplicity), clamped >= 1
    counts = jnp.zeros((num_vertices,), jnp.float32).at[face.reshape(-1)].add(1.0)
    full_nf_count = jnp.maximum(counts, 1.0).astype(jnp.int32)
    full_vt_map = jnp.arange(num_vertices, dtype=jnp.int32)
    filt_coeff = jax.nn.softmax(
        jax.random.normal(k_coeff, (num_faces, mesh_kernel_size), jnp.float32),
        axis=-1)

    params = init_encoder_mesh_block(k_params, in_channels, out_channels,
                                     growth_rate, mesh_kernel_size, max_iter)

    fwd = jax.jit(functools.partial(encoder_mesh_block, params))
    out = fwd(x, face, full_nf_count, full_vt_map, filt_coeff)
    out = jax.block_until_ready(out)
    assert out.shape == (num_vertices, out_channels), out.shape
    assert bool(jnp.all(jnp.isfinite(out)))
    print("KERNEL_OK")
</pallas_src>

<mosaic_0001>
module attributes {stable_mosaic.version = 11 : i64} {
  func.func @_mm_stats_kernel(%arg0: i32, %arg1: memref<24x128xbf16, #tpu.memory_space<vmem>>, %arg2: memref<128x128xbf16, #tpu.memory_space<vmem>>, %arg3: memref<24x128xbf16, #tpu.memory_space<vmem>>, %arg4: memref<1x128xf32, #tpu.memory_space<vmem>>, %arg5: memref<1x128xf32, #tpu.memory_space<vmem>>) attributes {dimension_semantics = [#tpu.dimension_semantics<parallel>], iteration_bounds = array<i64: 1>, scalar_prefetch = 0 : i64, scratch_operands = 0 : i64, tpu.core_type = #tpu.core_type<tc>, window_params = [{transform_indices = @transform_0, window_bounds = array<i64: 24, 128>}, {pipeline_mode = #tpu.pipeline_mode<synchronous>, transform_indices = @transform_1, window_bounds = array<i64: 128, 128>}, {transform_indices = @transform_2, window_bounds = array<i64: 24, 128>}, {transform_indices = @transform_3, window_bounds = array<i64: 1, 128>}, {transform_indices = @transform_4, window_bounds = array<i64: 1, 128>}]} {
    %c0 = arith.constant 0 : index
    %c0_0 = arith.constant 0 : index
    %0 = vector.load %arg1[%c0, %c0_0] : memref<24x128xbf16, #tpu.memory_space<vmem>>, vector<24x128xbf16>
    %c0_1 = arith.constant 0 : index
    %c0_2 = arith.constant 0 : index
    %1 = vector.load %arg2[%c0_1, %c0_2] : memref<128x128xbf16, #tpu.memory_space<vmem>>, vector<128x128xbf16>
    %cst = arith.constant dense<0.000000e+00> : vector<24x128xf32>
    %2 = tpu.matmul %0, %1, %cst {dimension_numbers = #tpu.dot_dimension_numbers<[1], [0], [0], [1], [0, 0, 1, 1], [], []>} : vector<24x128xbf16>, vector<128x128xbf16>, vector<24x128xf32> -> vector<24x128xf32>
    %cst_3 = arith.constant dense<0.000000e+00> : vector<128xf32>
    %3 = vector.multi_reduction <add>, %2, %cst_3 [0] : vector<24x128xf32> to vector<128xf32>
    %4 = vector.shape_cast %3 : vector<128xf32> to vector<1x128xf32>
    %c0_4 = arith.constant 0 : index
    %c0_5 = arith.constant 0 : index
    %5 = vector.load %arg4[%c0_4, %c0_5] : memref<1x128xf32, #tpu.memory_space<vmem>>, vector<1x128xf32>
    tpu.vector_store %arg4[%c0_4, %c0_5], %4 {strides = array<i32>} : memref<1x128xf32, #tpu.memory_space<vmem>>, vector<1x128xf32>,
    %6 = arith.mulf %2, %2 : vector<24x128xf32>
    %cst_6 = arith.constant dense<0.000000e+00> : vector<128xf32>
    %7 = vector.multi_reduction <add>, %6, %cst_6 [0] : vector<24x128xf32> to vector<128xf32>
    %8 = vector.shape_cast %7 : vector<128xf32> to vector<1x128xf32>
    %c0_7 = arith.constant 0 : index
    %c0_8 = arith.constant 0 : index
    %9 = vector.load %arg5[%c0_7, %c0_8] : memref<1x128xf32, #tpu.memory_space<vmem>>, vector<1x128xf32>
    tpu.vector_store %arg5[%c0_7, %c0_8], %8 {strides = array<i32>} : memref<1x128xf32, #tpu.memory_space<vmem>>, vector<1x128xf32>,
    %10 = arith.truncf %2 : vector<24x128xf32> to vector<24x128xbf16>
    %c0_9 = arith.constant 0 : index
    %c0_10 = arith.constant 0 : index
    %11 = vector.load %arg3[%c0_9, %c0_10] : memref<24x128xbf16, #tpu.memory_space<vmem>>, vector<24x128xbf16>
    tpu.vector_store %arg3[%c0_9, %c0_10], %10 {strides = array<i32>} : memref<24x128xbf16, #tpu.memory_space<vmem>>, vector<24x128xbf16>,
    return
  }
  func.func @transform_0(%arg0: i32) -> (i32, i32) {
    %c0_i32 = arith.constant 0 : i32
    %c0_i32_0 = arith.constant 0 : i32
    return %arg0, %c0_i32 : i32, i32
  }
  func.func @transform_1(%arg0: i32) -> (i32, i32) {
    %c0_i32 = arith.constant 0 : i32
    %c0_i32_0 = arith.constant 0 : i32
    %c0_i32_1 = arith.constant 0 : i32
    return %c0_i32, %c0_i32_0 : i32, i32
  }
  func.func @transform_2(%arg0: i32) -> (i32, i32) {
    %c0_i32 = arith.constant 0 : i32
    %c0_i32_0 = arith.constant 0 : i32
    return %arg0, %c0_i32 : i32, i32
  }
  func.func @transform_3(%arg0: i32) -> (i32, i32) {
    %c0_i32 = arith.constant 0 : i32
    %c0_i32_0 = arith.constant 0 : i32
    return %arg0, %c0_i32 : i32, i32
  }
  func.func @transform_4(%arg0: i32) -> (i32, i32) {
    %c0_i32 = arith.constant 0 : i32
    %c0_i32_0 = arith.constant 0 : i32
    return %arg0, %c0_i32 : i32, i32
  }
}

module attributes {stable_mosaic.version = 11 : i64} {
  func.func @_bn_relu_dw_kernel(%arg0: i32, %arg1: memref<24x128xbf16, #tpu.memory_space<vmem>>, %arg2: memref<1x128xf32, #tpu.memory_space<vmem>>, %arg3: memref<1x128xf32, #tpu.memory_space<vmem>>, %arg4: memref<24x3xf32, #tpu.memory_space<vmem>>, %arg5: memref<3x128xf32, #tpu.memory_space<vmem>>, %arg6: memref<24x128xf32, #tpu.memory_space<vmem>>) attributes {dimension_semantics = [#tpu.dimension_semantics<parallel>], iteration_bounds = array<i64: 1>, scalar_prefetch = 0 : i64, scratch_operands = 0 : i64, tpu.core_type = #tpu.core_type<tc>, window_params = [{transform_indices = @transform_0, window_bounds = array<i64: 24, 128>}, {pipeline_mode = #tpu.pipeline_mode<synchronous>, transform_indices = @transform_1, window_bounds = array<i64: 1, 128>}, {pipeline_mode = #tpu.pipeline_mode<synchronous>, transform_indices = @transform_2, window_bounds = array<i64: 1, 128>}, {transform_indices = @transform_3, window_bounds = array<i64: 24, 3>}, {pipeline_mode = #tpu.pipeline_mode<synchronous>, transform_indices = @transform_4, window_bounds = array<i64: 3, 128>}, {transform_indices = @transform_5, window_bounds = array<i64: 24, 128>}]} {
    %c0 = arith.constant 0 : index
    %c0_0 = arith.constant 0 : index
    %0 = vector.load %arg1[%c0, %c0_0] : memref<24x128xbf16, #tpu.memory_space<vmem>>, vector<24x128xbf16>
    %1 = arith.extf %0 : vector<24x128xbf16> to vector<24x128xf32>
    %c0_1 = arith.constant 0 : index
    %c0_2 = arith.constant 0 : index
    %2 = vector.load %arg2[%c0_1, %c0_2] : memref<1x128xf32, #tpu.memory_space<vmem>>, vector<1x128xf32>
    %3 = vector.broadcast %2 : vector<1x128xf32> to vector<24x128xf32>
    %4 = arith.mulf %1, %3 : vector<24x128xf32>
    %c0_3 = arith.constant 0 : index
    %c0_4 = arith.constant 0 : index
    %5 = vector.load %arg3[%c0_3, %c0_4] : memref<1x128xf32, #tpu.memory_space<vmem>>, vector<1x128xf32>
    %6 = vector.broadcast %5 : vector<1x128xf32> to vector<24x128xf32>
    %7 = arith.addf %4, %6 : vector<24x128xf32>
    %cst = arith.constant 0.000000e+00 : f32
    %8 = vector.broadcast %cst : f32 to vector<24x128xf32>
    %9 = arith.maximumf %7, %8 : vector<24x128xf32>
    %c0_5 = arith.constant 0 : index
    %c0_6 = arith.constant 0 : index
    %10 = vector.load %arg4[%c0_5, %c0_6] : memref<24x3xf32, #tpu.memory_space<vmem>>, vector<24x3xf32>
    %c0_7 = arith.constant 0 : index
    %c0_8 = arith.constant 0 : index
    %11 = vector.load %arg5[%c0_7, %c0_8] : memref<3x128xf32, #tpu.memory_space<vmem>>, vector<3x128xf32>
    %12 = vector.extract_strided_slice %10 {offsets = [0, 0], sizes = [24, 1], strides = [1, 1]} : vector<24x3xf32> to vector<24x1xf32>
    %13 = vector.extract_strided_slice %11 {offsets = [0, 0], sizes = [1, 128], strides = [1, 1]} : vector<3x128xf32> to vector<1x128xf32>
    %14 = vector.broadcast %12 : vector<24x1xf32> to vector<24x128xf32>
    %15 = vector.broadcast %13 : vector<1x128xf32> to vector<24x128xf32>
    %16 = arith.mulf %14, %15 : vector<24x128xf32>
    %17 = vector.extract_strided_slice %10 {offsets = [0, 1], sizes = [24, 1], strides = [1, 1]} : vector<24x3xf32> to vector<24x1xf32>
    %18 = vector.extract_strided_slice %11 {offsets = [1, 0], sizes = [1, 128], strides = [1, 1]} : vector<3x128xf32> to vector<1x128xf32>
    %19 = vector.broadcast %17 : vector<24x1xf32> to vector<24x128xf32>
    %20 = vector.broadcast %18 : vector<1x128xf32> to vector<24x128xf32>
    %21 = arith.mulf %19, %20 : vector<24x128xf32>
    %22 = arith.addf %16, %21 : vector<24x128xf32>
    %23 = vector.extract_strided_slice %10 {offsets = [0, 2], sizes = [24, 1], strides = [1, 1]} : vector<24x3xf32> to vector<24x1xf32>
    %24 = vector.extract_strided_slice %11 {offsets = [2, 0], sizes = [1, 128], strides = [1, 1]} : vector<3x128xf32> to vector<1x128xf32>
    %25 = vector.broadcast %23 : vector<24x1xf32> to vector<24x128xf32>
    %26 = vector.broadcast %24 : vector<1x128xf32> to vector<24x128xf32>
    %27 = arith.mulf %25, %26 : vector<24x128xf32>
    %28 = arith.addf %22, %27 : vector<24x128xf32>
    %29 = arith.mulf %9, %28 : vector<24x128xf32>
    %c0_9 = arith.constant 0 : index
    %c0_10 = arith.constant 0 : index
    %30 = vector.load %arg6[%c0_9, %c0_10] : memref<24x128xf32, #tpu.memory_space<vmem>>, vector<24x128xf32>
    tpu.vector_store %arg6[%c0_9, %c0_10], %29 {strides = array<i32>} : memref<24x128xf32, #tpu.memory_space<vmem>>, vector<24x128xf32>,
    return
  }
  func.func @transform_0(%arg0: i32) -> (i32, i32) {
    %c0_i32 = arith.constant 0 : i32
    %c0_i32_0 = arith.constant 0 : i32
    return %arg0, %c0_i32 : i32, i32
  }
  func.func @transform_1(%arg0: i32) -> (i32, i32) {
    %c0_i32 = arith.constant 0 : i32
    %c0_i32_0 = arith.constant 0 : i32
    %c0_i32_1 = arith.constant 0 : i32
    return %c0_i32, %c0_i32_0 : i32, i32
  }
  func.func @transform_2(%arg0: i32) -> (i32, i32) {
    %c0_i32 = arith.constant 0 : i32
    %c0_i32_0 = arith.constant 0 : i32
    %c0_i32_1 = arith.constant 0 : i32
    return %c0_i32, %c0_i32_0 : i32, i32
  }
  func.func @transform_3(%arg0: i32) -> (i32, i32) {
    %c0_i32 = arith.constant 0 : i32
    %c0_i32_0 = arith.constant 0 : i32
    return %arg0, %c0_i32 : i32, i32
  }
  func.func @transform_4(%arg0: i32) -> (i32, i32) {
    %c0_i32 = arith.constant 0 : i32
    %c0_i32_0 = arith.constant 0 : i32
    %c0_i32_1 = arith.constant 0 : i32
    return %c0_i32, %c0_i32_0 : i32, i32
  }
  func.func @transform_5(%arg0: i32) -> (i32, i32) {
    %c0_i32 = arith.constant 0 : i32
    %c0_i32_0 = arith.constant 0 : i32
    return %arg0, %c0_i32 : i32, i32
  }
}

module attributes {stable_mosaic.version = 11 : i64} {
  func.func @_mm_stats_scaled_kernel(%arg0: i32, %arg1: memref<16x128xf32, #tpu.memory_space<vmem>>, %arg2: memref<16x1xf32, #tpu.memory_space<vmem>>, %arg3: memref<128x128xbf16, #tpu.memory_space<vmem>>, %arg4: memref<16x128xbf16, #tpu.memory_space<vmem>>, %arg5: memref<1x128xf32, #tpu.memory_space<vmem>>, %arg6: memref<1x128xf32, #tpu.memory_space<vmem>>) attributes {dimension_semantics = [#tpu.dimension_semantics<parallel>], iteration_bounds = array<i64: 1>, scalar_prefetch = 0 : i64, scratch_operands = 0 : i64, tpu.core_type = #tpu.core_type<tc>, window_params = [{transform_indices = @transform_0, window_bounds = array<i64: 16, 128>}, {transform_indices = @transform_1, window_bounds = array<i64: 16, 1>}, {pipeline_mode = #tpu.pipeline_mode<synchronous>, transform_indices = @transform_2, window_bounds = array<i64: 128, 128>}, {transform_indices = @transform_3, window_bounds = array<i64: 16, 128>}, {transform_indices = @transform_4, window_bounds = array<i64: 1, 128>}, {transform_indices = @transform_5, window_bounds = array<i64: 1, 128>}]} {
    %c0 = arith.constant 0 : index
    %c0_0 = arith.constant 0 : index
    %0 = vector.load %arg1[%c0, %c0_0] : memref<16x128xf32, #tpu.memory_space<vmem>>, vector<16x128xf32>
    %c0_1 = arith.constant 0 : index
    %c0_2 = arith.constant 0 : index
    %1 = vector.load %arg2[%c0_1, %c0_2] : memref<16x1xf32, #tpu.memory_space<vmem>>, vector<16x1xf32>
    %2 = vector.broadcast %1 : vector<16x1xf32> to vector<16x128xf32>
    %3 = arith.mulf %0, %2 : vector<16x128xf32>
    %4 = arith.truncf %3 : vector<16x128xf32> to vector<16x128xbf16>
    %c0_3 = arith.constant 0 : index
    %c0_4 = arith.constant 0 : index
    %5 = vector.load %arg3[%c0_3, %c0_4] : memref<128x128xbf16, #tpu.memory_space<vmem>>, vector<128x128xbf16>
    %cst = arith.constant dense<0.000000e+00> : vector<16x128xf32>
    %6 = tpu.matmul %4, %5, %cst {dimension_numbers = #tpu.dot_dimension_numbers<[1], [0], [0], [1], [0, 0, 1, 1], [], []>} : vector<16x128xbf16>, vector<128x128xbf16>, vector<16x128xf32> -> vector<16x128xf32>
    %cst_5 = arith.constant dense<0.000000e+00> : vector<128xf32>
    %7 = vector.multi_reduction <add>, %6, %cst_5 [0] : vector<16x128xf32> to vector<128xf32>
    %8 = vector.shape_cast %7 : vector<128xf32> to vector<1x128xf32>
    %c0_6 = arith.constant 0 : index
    %c0_7 = arith.constant 0 : index
    %9 = vector.load %arg5[%c0_6, %c0_7] : memref<1x128xf32, #tpu.memory_space<vmem>>, vector<1x128xf32>
    tpu.vector_store %arg5[%c0_6, %c0_7], %8 {strides = array<i32>} : memref<1x128xf32, #tpu.memory_space<vmem>>, vector<1x128xf32>,
    %10 = arith.mulf %6, %6 : vector<16x128xf32>
    %cst_8 = arith.constant dense<0.000000e+00> : vector<128xf32>
    %11 = vector.multi_reduction <add>, %10, %cst_8 [0] : vector<16x128xf32> to vector<128xf32>
    %12 = vector.shape_cast %11 : vector<128xf32> to vector<1x128xf32>
    %c0_9 = arith.constant 0 : index
    %c0_10 = arith.constant 0 : index
    %13 = vector.load %arg6[%c0_9, %c0_10] : memref<1x128xf32, #tpu.memory_space<vmem>>, vector<1x128xf32>
    tpu.vector_store %arg6[%c0_9, %c0_10], %12 {strides = array<i32>} : memref<1x128xf32, #tpu.memory_space<vmem>>, vector<1x128xf32>,
    %14 = arith.truncf %6 : vector<16x128xf32> to vector<16x128xbf16>
    %c0_11 = arith.constant 0 : index
    %c0_12 = arith.constant 0 : index
    %15 = vector.load %arg4[%c0_11, %c0_12] : memref<16x128xbf16, #tpu.memory_space<vmem>>, vector<16x128xbf16>
    tpu.vector_store %arg4[%c0_11, %c0_12], %14 {strides = array<i32>} : memref<16x128xbf16, #tpu.memory_space<vmem>>, vector<16x128xbf16>,
    return
  }
  func.func @transform_0(%arg0: i32) -> (i32, i32) {
    %c0_i32 = arith.constant 0 : i32
    %c0_i32_0 = arith.constant 0 : i32
    return %arg0, %c0_i32 : i32, i32
  }
  func.func @transform_1(%arg0: i32) -> (i32, i32) {
    %c0_i32 = arith.constant 0 : i32
    %c0_i32_0 = arith.constant 0 : i32
    return %arg0, %c0_i32 : i32, i32
  }
  func.func @transform_2(%arg0: i32) -> (i32, i32) {
    %c0_i32 = arith.constant 0 : i32
    %c0_i32_0 = arith.constant 0 : i32
    %c0_i32_1 = arith.constant 0 : i32
    return %c0_i32, %c0_i32_0 : i32, i32
  }
  func.func @transform_3(%arg0: i32) -> (i32, i32) {
    %c0_i32 = arith.constant 0 : i32
    %c0_i32_0 = arith.constant 0 : i32
    return %arg0, %c0_i32 : i32, i32
  }
  func.func @transform_4(%arg0: i32) -> (i32, i32) {
    %c0_i32 = arith.constant 0 : i32
    %c0_i32_0 = arith.constant 0 : i32
    return %arg0, %c0_i32 : i32, i32
  }
  func.func @transform_5(%arg0: i32) -> (i32, i32) {
    %c0_i32 = arith.constant 0 : i32
    %c0_i32_0 = arith.constant 0 : i32
    return %arg0, %c0_i32 : i32, i32
  }
}

module attributes {stable_mosaic.version = 11 : i64} {
  func.func @_bn_relu_kernel(%arg0: i32, %arg1: memref<16x128xbf16, #tpu.memory_space<vmem>>, %arg2: memref<1x128xf32, #tpu.memory_space<vmem>>, %arg3: memref<1x128xf32, #tpu.memory_space<vmem>>, %arg4: memref<16x128xbf16, #tpu.memory_space<vmem>>) attributes {dimension_semantics = [#tpu.dimension_semantics<parallel>], iteration_bounds = array<i64: 1>, scalar_prefetch = 0 : i64, scratch_operands = 0 : i64, tpu.core_type = #tpu.core_type<tc>, window_params = [{transform_indices = @transform_0, window_bounds = array<i64: 16, 128>}, {pipeline_mode = #tpu.pipeline_mode<synchronous>, transform_indices = @transform_1, window_bounds = array<i64: 1, 128>}, {pipeline_mode = #tpu.pipeline_mode<synchronous>, transform_indices = @transform_2, window_bounds = array<i64: 1, 128>}, {transform_indices = @transform_3, window_bounds = array<i64: 16, 128>}]} {
    %c0 = arith.constant 0 : index
    %c0_0 = arith.constant 0 : index
    %0 = vector.load %arg1[%c0, %c0_0] : memref<16x128xbf16, #tpu.memory_space<vmem>>, vector<16x128xbf16>
    %1 = arith.extf %0 : vector<16x128xbf16> to vector<16x128xf32>
    %c0_1 = arith.constant 0 : index
    %c0_2 = arith.constant 0 : index
    %2 = vector.load %arg2[%c0_1, %c0_2] : memref<1x128xf32, #tpu.memory_space<vmem>>, vector<1x128xf32>
    %3 = vector.broadcast %2 : vector<1x128xf32> to vector<16x128xf32>
    %4 = arith.mulf %1, %3 : vector<16x128xf32>
    %c0_3 = arith.constant 0 : index
    %c0_4 = arith.constant 0 : index
    %5 = vector.load %arg3[%c0_3, %c0_4] : memref<1x128xf32, #tpu.memory_space<vmem>>, vector<1x128xf32>
    %6 = vector.broadcast %5 : vector<1x128xf32> to vector<16x128xf32>
    %7 = arith.addf %4, %6 : vector<16x128xf32>
    %cst = arith.constant 0.000000e+00 : f32
    %8 = vector.broadcast %cst : f32 to vector<16x128xf32>
    %9 = arith.maximumf %7, %8 : vector<16x128xf32>
    %10 = arith.truncf %9 : vector<16x128xf32> to vector<16x128xbf16>
    %c0_5 = arith.constant 0 : index
    %c0_6 = arith.constant 0 : index
    %11 = vector.load %arg4[%c0_5, %c0_6] : memref<16x128xbf16, #tpu.memory_space<vmem>>, vector<16x128xbf16>
    tpu.vector_store %arg4[%c0_5, %c0_6], %10 {strides = array<i32>} : memref<16x128xbf16, #tpu.memory_space<vmem>>, vector<16x128xbf16>,
    return
  }
  func.func @transform_0(%arg0: i32) -> (i32, i32) {
    %c0_i32 = arith.constant 0 : i32
    %c0_i32_0 = arith.constant 0 : i32
    return %arg0, %c0_i32 : i32, i32
  }
  func.func @transform_1(%arg0: i32) -> (i32, i32) {
    %c0_i32 = arith.constant 0 : i32
    %c0_i32_0 = arith.constant 0 : i32
    %c0_i32_1 = arith.constant 0 : i32
    return %c0_i32, %c0_i32_0 : i32, i32
  }
  func.func @transform_2(%arg0: i32) -> (i32, i32) {
    %c0_i32 = arith.constant 0 : i32
    %c0_i32_0 = arith.constant 0 : i32
    %c0_i32_1 = arith.constant 0 : i32
    return %c0_i32, %c0_i32_0 : i32, i32
  }
  func.func @transform_3(%arg0: i32) -> (i32, i32) {
    %c0_i32 = arith.constant 0 : i32
    %c0_i32_0 = arith.constant 0 : i32
    return %arg0, %c0_i32 : i32, i32
  }
}

module attributes {stable_mosaic.version = 11 : i64} {
  func.func @_bn_relu_kernel(%arg0: i32, %arg1: memref<16x128xbf16, #tpu.memory_space<vmem>>, %arg2: memref<1x128xf32, #tpu.memory_space<vmem>>, %arg3: memref<1x128xf32, #tpu.memory_space<vmem>>, %arg4: memref<16x128xf32, #tpu.memory_space<vmem>>) attributes {dimension_semantics = [#tpu.dimension_semantics<parallel>], iteration_bounds = array<i64: 1>, scalar_prefetch = 0 : i64, scratch_operands = 0 : i64, tpu.core_type = #tpu.core_type<tc>, window_params = [{transform_indices = @transform_0, window_bounds = array<i64: 16, 128>}, {pipeline_mode = #tpu.pipeline_mode<synchronous>, transform_indices = @transform_1, window_bounds = array<i64: 1, 128>}, {pipeline_mode = #tpu.pipeline_mode<synchronous>, transform_indices = @transform_2, window_bounds = array<i64: 1, 128>}, {transform_indices = @transform_3, window_bounds = array<i64: 16, 128>}]} {
    %c0 = arith.constant 0 : index
    %c0_0 = arith.constant 0 : index
    %0 = vector.load %arg1[%c0, %c0_0] : memref<16x128xbf16, #tpu.memory_space<vmem>>, vector<16x128xbf16>
    %1 = arith.extf %0 : vector<16x128xbf16> to vector<16x128xf32>
    %c0_1 = arith.constant 0 : index
    %c0_2 = arith.constant 0 : index
    %2 = vector.load %arg2[%c0_1, %c0_2] : memref<1x128xf32, #tpu.memory_space<vmem>>, vector<1x128xf32>
    %3 = vector.broadcast %2 : vector<1x128xf32> to vector<16x128xf32>
    %4 = arith.mulf %1, %3 : vector<16x128xf32>
    %c0_3 = arith.constant 0 : index
    %c0_4 = arith.constant 0 : index
    %5 = vector.load %arg3[%c0_3, %c0_4] : memref<1x128xf32, #tpu.memory_space<vmem>>, vector<1x128xf32>
    %6 = vector.broadcast %5 : vector<1x128xf32> to vector<16x128xf32>
    %7 = arith.addf %4, %6 : vector<16x128xf32>
    %cst = arith.constant 0.000000e+00 : f32
    %8 = vector.broadcast %cst : f32 to vector<16x128xf32>
    %9 = arith.maximumf %7, %8 : vector<16x128xf32>
    %c0_5 = arith.constant 0 : index
    %c0_6 = arith.constant 0 : index
    %10 = vector.load %arg4[%c0_5, %c0_6] : memref<16x128xf32, #tpu.memory_space<vmem>>, vector<16x128xf32>
    tpu.vector_store %arg4[%c0_5, %c0_6], %9 {strides = array<i32>} : memref<16x128xf32, #tpu.memory_space<vmem>>, vector<16x128xf32>,
    return
  }
  func.func @transform_0(%arg0: i32) -> (i32, i32) {
    %c0_i32 = arith.constant 0 : i32
    %c0_i32_0 = arith.constant 0 : i32
    return %arg0, %c0_i32 : i32, i32
  }
  func.func @transform_1(%arg0: i32) -> (i32, i32) {
    %c0_i32 = arith.constant 0 : i32
    %c0_i32_0 = arith.constant 0 : i32
    %c0_i32_1 = arith.constant 0 : i32
    return %c0_i32, %c0_i32_0 : i32, i32
  }
  func.func @transform_2(%arg0: i32) -> (i32, i32) {
    %c0_i32 = arith.constant 0 : i32
    %c0_i32_0 = arith.constant 0 : i32
    %c0_i32_1 = arith.constant 0 : i32
    return %c0_i32, %c0_i32_0 : i32, i32
  }
  func.func @transform_3(%arg0: i32) -> (i32, i32) {
    %c0_i32 = arith.constant 0 : i32
    %c0_i32_0 = arith.constant 0 : i32
    return %arg0, %c0_i32 : i32, i32
  }
}

module attributes {stable_mosaic.version = 11 : i64} {
  func.func @_mm_stats_kernel(%arg0: i32, %arg1: memref<16x128xbf16, #tpu.memory_space<vmem>>, %arg2: memref<128x128xbf16, #tpu.memory_space<vmem>>, %arg3: memref<16x128xbf16, #tpu.memory_space<vmem>>, %arg4: memref<1x128xf32, #tpu.memory_space<vmem>>, %arg5: memref<1x128xf32, #tpu.memory_space<vmem>>) attributes {dimension_semantics = [#tpu.dimension_semantics<parallel>], iteration_bounds = array<i64: 1>, scalar_prefetch = 0 : i64, scratch_operands = 0 : i64, tpu.core_type = #tpu.core_type<tc>, window_params = [{transform_indices = @transform_0, window_bounds = array<i64: 16, 128>}, {pipeline_mode = #tpu.pipeline_mode<synchronous>, transform_indices = @transform_1, window_bounds = array<i64: 128, 128>}, {transform_indices = @transform_2, window_bounds = array<i64: 16, 128>}, {transform_indices = @transform_3, window_bounds = array<i64: 1, 128>}, {transform_indices = @transform_4, window_bounds = array<i64: 1, 128>}]} {
    %c0 = arith.constant 0 : index
    %c0_0 = arith.constant 0 : index
    %0 = vector.load %arg1[%c0, %c0_0] : memref<16x128xbf16, #tpu.memory_space<vmem>>, vector<16x128xbf16>
    %c0_1 = arith.constant 0 : index
    %c0_2 = arith.constant 0 : index
    %1 = vector.load %arg2[%c0_1, %c0_2] : memref<128x128xbf16, #tpu.memory_space<vmem>>, vector<128x128xbf16>
    %cst = arith.constant dense<0.000000e+00> : vector<16x128xf32>
    %2 = tpu.matmul %0, %1, %cst {dimension_numbers = #tpu.dot_dimension_numbers<[1], [0], [0], [1], [0, 0, 1, 1], [], []>} : vector<16x128xbf16>, vector<128x128xbf16>, vector<16x128xf32> -> vector<16x128xf32>
    %cst_3 = arith.constant dense<0.000000e+00> : vector<128xf32>
    %3 = vector.multi_reduction <add>, %2, %cst_3 [0] : vector<16x128xf32> to vector<128xf32>
    %4 = vector.shape_cast %3 : vector<128xf32> to vector<1x128xf32>
    %c0_4 = arith.constant 0 : index
    %c0_5 = arith.constant 0 : index
    %5 = vector.load %arg4[%c0_4, %c0_5] : memref<1x128xf32, #tpu.memory_space<vmem>>, vector<1x128xf32>
    tpu.vector_store %arg4[%c0_4, %c0_5], %4 {strides = array<i32>} : memref<1x128xf32, #tpu.memory_space<vmem>>, vector<1x128xf32>,
    %6 = arith.mulf %2, %2 : vector<16x128xf32>
    %cst_6 = arith.constant dense<0.000000e+00> : vector<128xf32>
    %7 = vector.multi_reduction <add>, %6, %cst_6 [0] : vector<16x128xf32> to vector<128xf32>
    %8 = vector.shape_cast %7 : vector<128xf32> to vector<1x128xf32>
    %c0_7 = arith.constant 0 : index
    %c0_8 = arith.constant 0 : index
    %9 = vector.load %arg5[%c0_7, %c0_8] : memref<1x128xf32, #tpu.memory_space<vmem>>, vector<1x128xf32>
    tpu.vector_store %arg5[%c0_7, %c0_8], %8 {strides = array<i32>} : memref<1x128xf32, #tpu.memory_space<vmem>>, vector<1x128xf32>,
    %10 = arith.truncf %2 : vector<16x128xf32> to vector<16x128xbf16>
    %c0_9 = arith.constant 0 : index
    %c0_10 = arith.constant 0 : index
    %11 = vector.load %arg3[%c0_9, %c0_10] : memref<16x128xbf16, #tpu.memory_space<vmem>>, vector<16x128xbf16>
    tpu.vector_store %arg3[%c0_9, %c0_10], %10 {strides = array<i32>} : memref<16x128xbf16, #tpu.memory_space<vmem>>, vector<16x128xbf16>,
    return
  }
  func.func @transform_0(%arg0: i32) -> (i32, i32) {
    %c0_i32 = arith.constant 0 : i32
    %c0_i32_0 = arith.constant 0 : i32
    return %arg0, %c0_i32 : i32, i32
  }
  func.func @transform_1(%arg0: i32) -> (i32, i32) {
    %c0_i32 = arith.constant 0 : i32
    %c0_i32_0 = arith.constant 0 : i32
    %c0_i32_1 = arith.constant 0 : i32
    return %c0_i32, %c0_i32_0 : i32, i32
  }
  func.func @transform_2(%arg0: i32) -> (i32, i32) {
    %c0_i32 = arith.constant 0 : i32
    %c0_i32_0 = arith.constant 0 : i32
    return %arg0, %c0_i32 : i32, i32
  }
  func.func @transform_3(%arg0: i32) -> (i32, i32) {
    %c0_i32 = arith.constant 0 : i32
    %c0_i32_0 = arith.constant 0 : i32
    return %arg0, %c0_i32 : i32, i32
  }
  func.func @transform_4(%arg0: i32) -> (i32, i32) {
    %c0_i32 = arith.constant 0 : i32
    %c0_i32_0 = arith.constant 0 : i32
    return %arg0, %c0_i32 : i32, i32
  }
}

</mosaic_0001>

<bundles_post_ra>
// kernel: encoder_mesh_block.19
= control target key start
LH: loop header
LB: loop body
LE: loop exit
PB: predicated region body
PF: predicated region fallthrough
CT: control target
= control target key end

     0   :  { %v130_v0 = vmov 0   ;;  %v131_v4 = vmov 1   ;;  %v132_v5 = vmov 2   ;;  %s196_s3 = inlined_call_operand.vmem [shape: f32[24,3], index: 3, kind: input, shape index: {}]   ;;  %s197_s1 = inlined_call_operand.vmem [shape: f32[1,128], index: 1, kind: input, shape index: {}]   ;;  %s198_s2 = inlined_call_operand.vmem [shape: f32[1,128], index: 2, kind: input, shape index: {}]   ;;  %s199_s0 = inlined_call_operand.vmem [shape: bf16[24,128], index: 0, kind: input, shape index: {}]   ;;  %s200_s4 = inlined_call_operand.vmem [shape: f32[3,128], index: 4, kind: input, shape index: {}]   ;;  %s201_s5 = inlined_call_operand.vmem [shape: f32[24,128], index: 5, kind: output, shape index: {}]  }
   0x1   :  { %122 = vset.pattern.permute.xlu1 %v130_v0  ;;  %121 = vset.pattern.permute.xlu0 %v130_v0  ;;  %v45_v1 = vld [vmem:[%s196_s3 + $0x10] sm:$0xff]  ;;  %v43_v2 = vld [vmem:[%s196_s3] sm:$0xff]  ;;  %v44_v3 = vld [vmem:[%s196_s3 + $0x8] sm:$0xff] }
   0x2   :  { %59 = vperm.xlu1 %122, %v45_v1   ;;  %49 = vperm.xlu0 %121, %v43_v2   ;;  %v22_v8 = vld [vmem:[%s199_s0 + $0x8] sm:$0xf]  ;;  %v128_v10 = vld [vmem:[%s197_s1] ss:$0 sm:$0xff] }
   0x3   :  { %124 = vset.pattern.permute.xlu2 %v131_v4  ;;  %v25_v9 = vunpack.c.l.bf16 %v22_v8  ;;  %v46_v11 = vld [vmem:[%s200_s4] sm:$0x7] }
   0x4   :  { %71 = vperm.xlu2 %124, %v44_v3   ;;  %v78_v12 = vperm.slane %v46_v11, 1  ;;  %v129_v14 = vld [vmem:[%s198_s2] ss:$0 sm:$0xff]  ;;  %v62_v15 = vperm.slane %v46_v11, 0  ;;  %v97_v16 = vperm.slane %v46_v11, 2 }
   0x5   :  { %v32_v13 = vmul.f32 %v128_v10, %v25_v9  ;;  %v115_v26 = vld [vmem:[%s199_s0] sm:$0xff]  }
   0x6   :  { %v116_v28 = vunpack.c.l.bf16 %v115_v26  ;;  %v117_v30 = vunpack.c.h.bf16 %v115_v26 }
   0x7   :  { %v39_v19 = vadd.f32 %v129_v14, %v32_v13 }
   0x8   :  { %v30_v33 = vmul.f32 %v128_v10, %v116_v28  ;;  %v31_v34 = vmul.f32 %v128_v10, %v117_v30 }
   0x9   :  { %v42_v25 = vmax.f32 %v39_v19, 0.0 }
   0xa   :  { %123 = vset.pattern.permute.xlu1 %v131_v4  ;;  %54 = vperm.xlu0 %121, %v44_v3   ;;  %v37_v36 = vadd.f32 %v129_v14, %v30_v33  ;;  %v38_v38 = vadd.f32 %v129_v14, %v31_v34 }
   0xb   :  { %67 = vperm.xlu1 %123, %v43_v2  }
   0xc   :  { %75 = vperm.xlu2 %124, %v45_v1   ;;  %v40_v43 = vmax.f32 %v37_v36, 0.0  ;;  %v41_v47 = vmax.f32 %v38_v38, 0.0 }
  0x12   :  { %125 = vset.pattern.permute.xlu0 %v132_v5 }
  0x13   :  { %126 = vset.pattern.permute.xlu1 %v132_v5  ;;  %86 = vperm.xlu0 %125, %v43_v2  }
  0x14   :  { %90 = vperm.xlu1 %126, %v44_v3   ;;  %127 = vset.pattern.permute.xlu2 %v132_v5 }
  0x15   :  { %94 = vperm.xlu2 %127, %v45_v1  }
  0x5e   :  { %v72_v6 = vpop.permute.xlu2 %71 }
  0x5f   :  { %v80_v40 = vmul.f32 %v78_v12, %v72_v6 }
  0x66   :  { %v76_v7 = vpop.permute.xlu2 %75 }
  0x67   :  { %v81_v18 = vmul.f32 %v78_v12, %v76_v7 }
  0x6f   :  { %v95_v17 = vpop.permute.xlu2 %94 }
  0x70   :  { %v100_v23 = vmul.f32 %v97_v16, %v95_v17 }
  0x74   :  { %v60_v20 = vpop.permute.xlu1 %59  ;;  %v50_v21 = vpop.permute.xlu0 %49 }
  0x75   :  { %v65_v22 = vmul.f32 %v62_v15, %v60_v20  ;;  %v63_v39 = vmul.f32 %v62_v15, %v50_v21 }
  0x77   :  { %v84_v24 = vadd.f32 %v81_v18, %v65_v22 }
  0x79   :  { %v103_v27 = vadd.f32 %v100_v23, %v84_v24 }
  0x7b   :  { %v106_v29 = vmul.f32 %v103_v27, %v42_v25 }
  0x7c   :  { %v55_v31 = vpop.permute.xlu0 %54 }
  0x7d   :  { %109 = vst [vmem:[%s201_s5 + $0x10] sm:$0xff] %v106_v29  ;;  %v68_v32 = vpop.permute.xlu1 %67  ;;  %v64_v37 = vmul.f32 %v62_v15, %v55_v31 }
  0x7e   :  { %v79_v35 = vmul.f32 %v78_v12, %v68_v32 }
  0x7f   :  { %v83_v46 = vadd.f32 %v80_v40, %v64_v37 }
  0x80   :  { %v82_v42 = vadd.f32 %v79_v35, %v63_v39 }
  0x85   :  { %v87_v41 = vpop.permute.xlu0 %86 }
  0x86   :  { %v98_v44 = vmul.f32 %v97_v16, %v87_v41  ;;  %v91_v45 = vpop.permute.xlu1 %90 }
  0x87   :  { %v99_v48 = vmul.f32 %v97_v16, %v91_v45 }
  0x88   :  { %v101_v49 = vadd.f32 %v98_v44, %v82_v42 }
  0x89   :  { %v102_v50 = vadd.f32 %v99_v48, %v83_v46 }
  0x8a   :  { %v104_v51 = vmul.f32 %v101_v49, %v40_v43 }
  0x8b   :  { %v105_v52 = vmul.f32 %v102_v50, %v41_v47 }
  0x8c   :  { %107 = vst [vmem:[%s201_s5] sm:$0xff] %v104_v51 }
  0x8d   :  { %108 = vst [vmem:[%s201_s5 + $0x8] sm:$0xff] %v105_v52 }

// kernel: encoder_mesh_block.18
= control target key start
LH: loop header
LB: loop body
LE: loop exit
PB: predicated region body
PF: predicated region fallthrough
CT: control target
= control target key end

     0   :  { %s273_s1 = inlined_call_operand.vmem [shape: bf16[128,128], index: 1, kind: input, shape index: {}]   ;;  %s274_s0 = inlined_call_operand.vmem [shape: bf16[24,128], index: 0, kind: input, shape index: {}]   ;;  %s275_s2 = inlined_call_operand.vmem [shape: bf16[24,128], index: 2, kind: output, shape index: {0}]   ;;  %s276_s3 = inlined_call_operand.vmem [shape: f32[1,128], index: 3, kind: output, shape index: {1}]   ;;  %s277_s4 = inlined_call_operand.vmem [shape: f32[1,128], index: 4, kind: output, shape index: {2}]  }
   0x1   :  { %v192_v0 = vld [vmem:[%s273_s1 + $0x38] sm:$0xff]  ;;  %v191_v1 = vld [vmem:[%s273_s1 + $0x30] sm:$0xff]  ;;  %v190_v2 = vld [vmem:[%s273_s1 + $0x28] sm:$0xff] }
   0x2   :  { %91 = vmatpush.bf16.msra.mxu0 %v192_v0  ;;  %198 = vmatpush.bf16.msra.mxu1 %v192_v0  ;;  %v189_v3 = vld [vmem:[%s273_s1 + $0x20] sm:$0xff]  ;;  %v188_v4 = vld [vmem:[%s273_s1 + $0x18] sm:$0xff]  ;;  %v187_v5 = vld [vmem:[%s273_s1 + $0x10] sm:$0xff] }
   0x3   :  { %v186_v6 = vld [vmem:[%s273_s1 + $0x8] sm:$0xff]  ;;  %v185_v9 = vld [vmem:[%s273_s1] sm:$0xff] }
   0x4   :  { %v16_v7 = vld [vmem:[%s274_s0 + $0x8] sm:$0xf]  ;;  %v184_v10 = vld [vmem:[%s274_s0] sm:$0xff] }
   0x5   :  { %v38_v8 = vunpack.c.l.b16 %v16_v7 }
   0x6   :  { %92 = vmatpush.bf16.msra.mxu0 %v191_v1  ;;  %199 = vmatpush.bf16.msra.mxu1 %v191_v1 }
   0x7   :  { %v40_v11 = vpack.c.b16 %v38_v8, %v38_v8 }
   0xa   :  { %93 = vmatpush.bf16.msra.mxu0 %v190_v2  ;;  %200 = vmatpush.bf16.msra.mxu1 %v190_v2 }
   0xe   :  { %94 = vmatpush.bf16.msra.mxu0 %v189_v3  ;;  %201 = vmatpush.bf16.msra.mxu1 %v189_v3 }
  0x12   :  { %95 = vmatpush.bf16.msra.mxu0 %v188_v4  ;;  %202 = vmatpush.bf16.msra.mxu1 %v188_v4 }
  0x16   :  { %96 = vmatpush.bf16.msra.mxu0 %v187_v5  ;;  %203 = vmatpush.bf16.msra.mxu1 %v187_v5 }
  0x1a   :  { %97 = vmatpush.bf16.msra.mxu0 %v186_v6  ;;  %204 = vmatpush.bf16.msra.mxu1 %v186_v6 }
  0x1e   :  { %98 = vmatpush.bf16.msra.mxu0 %v185_v9  ;;  %205 = vmatpush.bf16.msra.mxu1 %v185_v9 }
  0x21   :  { %99 = vmatmul.bf16.vlgmr.msra.gmra.mxu0 %v184_v10  ;;  %104 = vmatmul.bf16.vlgmr.msra.gmra.mxu1 %v40_v11 }
  0x9e   :  { %v100_v12 = vpop.f32.mrf.mxu0  ;;  %v105_v13 = vpop.f32.mrf.mxu1 }
  0x9f   :  { %v132_v14 = vpack.c.bf16 %v105_v13, %v105_v13  ;;  %v118_v15 = vmul.f32 %v100_v12, %v100_v12  ;;  %v120_v18 = vmul.f32 %v105_v13, %v105_v13 }
  0xa1   :  { %135 = vst [vmem:[%s275_s2 + $0x8] sm:$0xf] %v132_v14 }
  0xa6   :  { %v102_v16 = vpop.f32.mrf.mxu0  ;;  %v107_v17 = vpop.f32.mrf.mxu1 }
  0xa7   :  { %v109_v19 = vadd.f32 %v102_v16, %v100_v12  ;;  %v119_v20 = vmul.f32 %v102_v16, %v102_v16  ;;  %v196_v21 = vpack.c.bf16 %v102_v16, %v100_v12 }
  0xa9   :  { %v110_v22 = vadd.f32 %v109_v19, %v105_v13  ;;  %v121_v23 = vadd.f32 %v119_v20, %v118_v15  ;;  %197 = vst [vmem:[%s275_s2] sm:$0xff] %v196_v21  }
  0xab   :  { %v111_v24 = vrot.slane %v110_v22, 4  ;;  %v122_v25 = vadd.f32 %v121_v23, %v120_v18 }
  0xad   :  { %v112_v26 = vadd.f32 %v111_v24, %v110_v22  ;;  %v123_v27 = vrot.slane %v122_v25, 4 }
  0xaf   :  { %v113_v28 = vrot.slane %v112_v26, 2  ;;  %v124_v29 = vadd.f32 %v123_v27, %v122_v25 }
  0xb1   :  { %v114_v30 = vadd.f32 %v113_v28, %v112_v26  ;;  %v125_v31 = vrot.slane %v124_v29, 2 }
  0xb3   :  { %v115_v32 = vrot.slane %v114_v30, 1  ;;  %v126_v33 = vadd.f32 %v125_v31, %v124_v29 }
  0xb5   :  { %v116_v34 = vadd.f32 %v115_v32, %v114_v30  ;;  %v127_v35 = vrot.slane %v126_v33, 1 }
  0xb7   :  { %117 = vst [vmem:[%s276_s3] sm:$0x1] %v116_v34  ;;  %v128_v36 = vadd.f32 %v127_v35, %v126_v33 }
  0xb9   :  { %129 = vst [vmem:[%s277_s4] sm:$0x1] %v128_v36 }

// kernel: encoder_mesh_block.20
= control target key start
LH: loop header
LB: loop body
LE: loop exit
PB: predicated region body
PF: predicated region fallthrough
CT: control target
= control target key end

     0   :  { %v193_v0 = vmov 0   ;;  %s269_s1 = inlined_call_operand.vmem [shape: f32[16,1], index: 1, kind: input, shape index: {}]   ;;  %s270_s2 = inlined_call_operand.vmem [shape: bf16[128,128], index: 2, kind: input, shape index: {}]   ;;  %s271_s0 = inlined_call_operand.vmem [shape: f32[16,128], index: 0, kind: input, shape index: {}]   ;;  %s272_s3 = inlined_call_operand.vmem [shape: bf16[16,128], index: 3, kind: output, shape index: {0}]   ;;  %s273_s4 = inlined_call_operand.vmem [shape: f32[1,128], index: 4, kind: output, shape index: {1}]   ;;  %s274_s5 = inlined_call_operand.vmem [shape: f32[1,128], index: 5, kind: output, shape index: {2}]  }
   0x1   :  { %192 = vset.pattern.permute.xlu0 %v193_v0  ;;  %v19_v1 = vld [vmem:[%s269_s1] sm:$0xff]  ;;  %v185_v2 = vld [vmem:[%s270_s2 + $0x38] sm:$0xff]  ;;  %v184_v3 = vld [vmem:[%s270_s2 + $0x30] sm:$0xff] }
   0x2   :  { %23 = vperm.xlu0 %192, %v19_v1   ;;  %98 = vmatpush.bf16.msra.mxu0 %v185_v2  ;;  %v20_v4 = vld [vmem:[%s269_s1 + $0x8] sm:$0xff]  ;;  %v182_v6 = vld [vmem:[%s270_s2 + $0x20] sm:$0xff]  ;;  %v181_v7 = vld [vmem:[%s270_s2 + $0x18] sm:$0xff] }
   0x3   :  { %v183_v5 = vld [vmem:[%s270_s2 + $0x28] sm:$0xff]  ;;  %v180_v8 = vld [vmem:[%s270_s2 + $0x10] sm:$0xff]  ;;  %v178_v10 = vld [vmem:[%s270_s2] sm:$0xff] }
   0x4   :  { %v179_v9 = vld [vmem:[%s270_s2 + $0x8] sm:$0xff]  ;;  %v17_v12 = vld [vmem:[%s271_s0] sm:$0xff] }
   0x5   :  { %v18_v13 = vld [vmem:[%s271_s0 + $0x8] sm:$0xff] }
   0x6   :  { %99 = vmatpush.bf16.msra.mxu0 %v184_v3 }
   0xa   :  { %28 = vperm.xlu0 %192, %v20_v4   ;;  %100 = vmatpush.bf16.msra.mxu0 %v183_v5 }
   0xe   :  { %101 = vmatpush.bf16.msra.mxu0 %v182_v6 }
  0x12   :  { %102 = vmatpush.bf16.msra.mxu0 %v181_v7 }
  0x16   :  { %103 = vmatpush.bf16.msra.mxu0 %v180_v8 }
  0x1a   :  { %104 = vmatpush.bf16.msra.mxu0 %v179_v9 }
  0x1e   :  { %105 = vmatpush.bf16.msra.mxu0 %v178_v10 }
  0x74   :  { %v24_v11 = vpop.permute.xlu0 %23 }
  0x75   :  { %v31_v15 = vmul.f32 %v24_v11, %v17_v12 }
  0x7c   :  { %v29_v14 = vpop.permute.xlu0 %28 }
  0x7d   :  { %v32_v16 = vmul.f32 %v29_v14, %v18_v13 }
  0x7f   :  { %v33_v17 = vpack.c.bf16 %v32_v16, %v31_v15 }
  0x81   :  { %106 = vmatmul.bf16.vlgmr.msra.gmra.mxu0 %v33_v17 }
  0xfe   :  { %v107_v18 = vpop.f32.mrf.mxu0 }
  0xff   :  { %v120_v20 = vmul.f32 %v107_v18, %v107_v18 }
 0x106   :  { %v109_v19 = vpop.f32.mrf.mxu0 }
 0x107   :  { %v112_v21 = vadd.f32 %v109_v19, %v107_v18  ;;  %v121_v22 = vmul.f32 %v109_v19, %v109_v19  ;;  %v189_v23 = vpack.c.bf16 %v109_v19, %v107_v18 }
 0x109   :  { %v113_v24 = vrot.slane %v112_v21, 4  ;;  %v122_v25 = vadd.f32 %v121_v22, %v120_v20  ;;  %190 = vst [vmem:[%s272_s3] sm:$0xff] %v189_v23  }
 0x10b   :  { %v114_v26 = vadd.f32 %v113_v24, %v112_v21  ;;  %v123_v27 = vrot.slane %v122_v25, 4 }
 0x10d   :  { %v115_v28 = vrot.slane %v114_v26, 2  ;;  %v124_v29 = vadd.f32 %v123_v27, %v122_v25 }
 0x10f   :  { %v116_v30 = vadd.f32 %v115_v28, %v114_v26  ;;  %v125_v31 = vrot.slane %v124_v29, 2 }
 0x111   :  { %v117_v32 = vrot.slane %v116_v30, 1  ;;  %v126_v33 = vadd.f32 %v125_v31, %v124_v29 }
 0x113   :  { %v118_v34 = vadd.f32 %v117_v32, %v116_v30  ;;  %v127_v35 = vrot.slane %v126_v33, 1 }
 0x115   :  { %119 = vst [vmem:[%s273_s4] sm:$0x1] %v118_v34  ;;  %v128_v36 = vadd.f32 %v127_v35, %v126_v33 }
 0x117   :  { %129 = vst [vmem:[%s274_s5] sm:$0x1] %v128_v36 }

// kernel: encoder_mesh_block.21
= control target key start
LH: loop header
LB: loop body
LE: loop exit
PB: predicated region body
PF: predicated region fallthrough
CT: control target
= control target key end

     0   :  { %s83_s0 = inlined_call_operand.vmem [shape: bf16[16,128], index: 0, kind: input, shape index: {}]   ;;  %s84_s1 = inlined_call_operand.vmem [shape: f32[1,128], index: 1, kind: input, shape index: {}]   ;;  %s85_s2 = inlined_call_operand.vmem [shape: f32[1,128], index: 2, kind: input, shape index: {}]   ;;  %s86_s3 = inlined_call_operand.vmem [shape: bf16[16,128], index: 3, kind: output, shape index: {}]  }
   0x1   :  { %v41_v0 = vld [vmem:[%s83_s0] sm:$0xff]  }
   0x2   :  { %v49_v1 = vld [vmem:[%s84_s1] ss:$0 sm:$0xff]  ;;  %v42_v2 = vunpack.c.l.bf16 %v41_v0  ;;  %v43_v3 = vunpack.c.h.bf16 %v41_v0 }
   0x3   :  { %v50_v4 = vld [vmem:[%s85_s2] ss:$0 sm:$0xff] }
   0x4   :  { %v22_v5 = vmul.f32 %v49_v1, %v42_v2  ;;  %v23_v6 = vmul.f32 %v49_v1, %v43_v3 }
   0x6   :  { %v28_v7 = vadd.f32 %v50_v4, %v22_v5  ;;  %v29_v8 = vadd.f32 %v50_v4, %v23_v6 }
   0x8   :  { %v30_v9 = vmax.f32 %v28_v7, 0.0  ;;  %v31_v10 = vmax.f32 %v29_v8, 0.0 }
   0xa   :  { %v47_v11 = vpack.c.bf16 %v31_v10, %v30_v9 }
   0xc   :  { %48 = vst [vmem:[%s86_s3] sm:$0xff] %v47_v11  }

// kernel: encoder_mesh_block.35
= control target key start
LH: loop header
LB: loop body
LE: loop exit
PB: predicated region body
PF: predicated region fallthrough
CT: control target
= control target key end

     0   :  { %s123_s0 = inlined_call_operand.vmem [shape: bf16[16,128], index: 0, kind: input, shape index: {}]   ;;  %s124_s1 = inlined_call_operand.vmem [shape: f32[1,128], index: 1, kind: input, shape index: {}]   ;;  %s125_s2 = inlined_call_operand.vmem [shape: f32[1,128], index: 2, kind: input, shape index: {}]   ;;  %s126_s3 = inlined_call_operand.hbm [shape: f32[16,128], index: 3, kind: output, shape index: {}]  }
   0x1   :  { %v54_v0 = vld [vmem:[%s123_s0] sm:$0xff]  }
   0x2   :  { %v60_v1 = vld [vmem:[%s124_s1] ss:$0 sm:$0xff]  ;;  %v55_v2 = vunpack.c.l.bf16 %v54_v0  ;;  %v56_v4 = vunpack.c.h.bf16 %v54_v0 }
   0x3   :  { %v61_v3 = vld [vmem:[%s125_s2] ss:$0 sm:$0xff] }
   0x4   :  { %8 = vsyncpa [#allocation3], 0  ;;  %v23_v5 = vmul.f32 %v60_v1, %v55_v2  ;;  %v24_v6 = vmul.f32 %v60_v1, %v56_v4  ;;  %s88_s18 = smov [#allocation2]   ;;  %s41_s22 = sshll.u32 %s126_s3, 4  ;;  %s42_s22 = int_to_ptr.hbm [resolvable:$true] %s41_s22 }
   0x5   :  { %s39_s19 = sshll.u32 %s88_s18, 4  ;;  %s89_s0 = smov 128   ;;  %s40_s19 = int_to_ptr.vmem [resolvable:$true] %s39_s19 }
   0x6   :  { %v29_v7 = vadd.f32 %v61_v3, %v23_v5  ;;  %v30_v8 = vadd.f32 %v61_v3, %v24_v6  ;;  %s90_s1 = smov 8  }
   0x8   :  { %v31_v9 = vmax.f32 %v29_v7, 0.0  ;;  %v32_v10 = vmax.f32 %v30_v8, 0.0 }
   0xa   :  { %33 = vst [vmem:[#allocation2] sm:$0xff] %v31_v9 }
   0xb   :  { %34 = vst [vmem:[#allocation2 + $0x8] sm:$0xff] %v32_v10 }
   0xc   :  { %47 = dma.vmem_to_hbm [thread:$0]  %s40_s19, 256, %s42_s22, [#allocation3], %s89_s0, %s89_s0, %s90_s1  }
   0xd   :  { %86 = dma.done.wait [#allocation3], 256  }
   0xe   :  { %87 = vsyncadd [#allocation3], 4294967040 }
   0xf   :  { %52 = vsyncpa [#allocation3], 1 }

// kernel: encoder_mesh_block.34
= control target key start
LH: loop header
LB: loop body
LE: loop exit
PB: predicated region body
PF: predicated region fallthrough
CT: control target
= control target key end

     0   :  { %s245_s1 = inlined_call_operand.vmem [shape: bf16[128,128], index: 1, kind: input, shape index: {}]   ;;  %s246_s0 = inlined_call_operand.vmem [shape: bf16[16,128], index: 0, kind: input, shape index: {}]   ;;  %s247_s2 = inlined_call_operand.vmem [shape: bf16[16,128], index: 2, kind: output, shape index: {0}]   ;;  %s248_s3 = inlined_call_operand.vmem [shape: f32[1,128], index: 3, kind: output, shape index: {1}]   ;;  %s249_s4 = inlined_call_operand.vmem [shape: f32[1,128], index: 4, kind: output, shape index: {2}]  }
   0x1   :  { %v178_v0 = vld [vmem:[%s245_s1 + $0x38] sm:$0xff]  ;;  %v177_v1 = vld [vmem:[%s245_s1 + $0x30] sm:$0xff]  ;;  %v176_v2 = vld [vmem:[%s245_s1 + $0x28] sm:$0xff] }
   0x2   :  { %86 = vmatpush.bf16.msra.mxu0 %v178_v0  ;;  %v175_v3 = vld [vmem:[%s245_s1 + $0x20] sm:$0xff]  ;;  %v174_v4 = vld [vmem:[%s245_s1 + $0x18] sm:$0xff]  ;;  %v173_v5 = vld [vmem:[%s245_s1 + $0x10] sm:$0xff] }
   0x3   :  { %v172_v6 = vld [vmem:[%s245_s1 + $0x8] sm:$0xff]  ;;  %v171_v7 = vld [vmem:[%s245_s1] sm:$0xff] }
   0x4   :  { %v170_v8 = vld [vmem:[%s246_s0] sm:$0xff] }
   0x6   :  { %87 = vmatpush.bf16.msra.mxu0 %v177_v1 }
   0xa   :  { %88 = vmatpush.bf16.msra.mxu0 %v176_v2 }
   0xe   :  { %89 = vmatpush.bf16.msra.mxu0 %v175_v3 }
  0x12   :  { %90 = vmatpush.bf16.msra.mxu0 %v174_v4 }
  0x16   :  { %91 = vmatpush.bf16.msra.mxu0 %v173_v5 }
  0x1a   :  { %92 = vmatpush.bf16.msra.mxu0 %v172_v6 }
  0x1e   :  { %93 = vmatpush.bf16.msra.mxu0 %v171_v7 }
  0x21   :  { %94 = vmatmul.bf16.vlgmr.msra.gmra.mxu0 %v170_v8 }
  0x9e   :  { %v95_v9 = vpop.f32.mrf.mxu0 }
  0x9f   :  { %v108_v11 = vmul.f32 %v95_v9, %v95_v9 }
  0xa6   :  { %v97_v10 = vpop.f32.mrf.mxu0 }
  0xa7   :  { %v100_v12 = vadd.f32 %v97_v10, %v95_v9  ;;  %v109_v13 = vmul.f32 %v97_v10, %v97_v10  ;;  %v182_v14 = vpack.c.bf16 %v97_v10, %v95_v9 }
  0xa9   :  { %v101_v15 = vrot.slane %v100_v12, 4  ;;  %v110_v16 = vadd.f32 %v109_v13, %v108_v11  ;;  %183 = vst [vmem:[%s247_s2] sm:$0xff] %v182_v14  }
  0xab   :  { %v102_v17 = vadd.f32 %v101_v15, %v100_v12  ;;  %v111_v18 = vrot.slane %v110_v16, 4 }
  0xad   :  { %v103_v19 = vrot.slane %v102_v17, 2  ;;  %v112_v20 = vadd.f32 %v111_v18, %v110_v16 }
  0xaf   :  { %v104_v21 = vadd.f32 %v103_v19, %v102_v17  ;;  %v113_v22 = vrot.slane %v112_v20, 2 }
  0xb1   :  { %v105_v23 = vrot.slane %v104_v21, 1  ;;  %v114_v24 = vadd.f32 %v113_v22, %v112_v20 }
  0xb3   :  { %v106_v25 = vadd.f32 %v105_v23, %v104_v21  ;;  %v115_v26 = vrot.slane %v114_v24, 1 }
  0xb5   :  { %107 = vst [vmem:[%s248_s3] sm:$0x1] %v106_v25  ;;  %v116_v27 = vadd.f32 %v115_v26, %v114_v24 }
  0xb7   :  { %117 = vst [vmem:[%s249_s4] sm:$0x1] %v116_v27 }

</bundles_post_ra>
